<compile_context>
chip_gen: v7x
topology: tpu7x:2x2x1
jax: 0.10.0
libtpu: 0.0.40
codegen_flags: <defaults>
</compile_context>

<pallas_src>
import functools

import jax
import jax.numpy as jnp
from jax.experimental import pallas as pl
from jax.experimental.pallas import tpu as pltpu


# ----------------------------------------------------------------------------- kernels

def _resident_kernel(x_ref, w_ref, b_ref, o_ref, *, neg_slope, eps):
    # x_ref: (TB, E)           batch tile of input latents
    # w_ref: (depth, E, E)     per-layer weights, pre-transposed to (in, out), pre-scaled by lr_mul
    # b_ref: (depth, 1, E)     per-layer biases, pre-scaled by lr_mul (f32)
    # o_ref: (TB, E)
    depth = w_ref.shape[0]

    x = x_ref[...].astype(jnp.float32)
    # F.normalize(x, dim=1): x / clamp_min(||x||, eps)  ==  x * rsqrt(max(ss, eps^2))
    ss = jnp.sum(x * x, axis=-1, keepdims=True)
    h = x * jax.lax.rsqrt(jnp.maximum(ss, eps * eps))

    # Unrolled layer loop: depth is a small compile-time constant, every weight tile is
    # VMEM-resident -> each iteration is one MXU matmul + a minimal VPU epilogue.
    for l in range(depth):
        acc = jnp.dot(h.astype(w_ref.dtype), w_ref[l],
                      preferred_element_type=jnp.float32)
        acc = acc + b_ref[l]                         # lr_mul already folded into W and b
        h = jnp.maximum(acc, neg_slope * acc)        # leaky_relu(0.2), 0 < slope < 1

    o_ref[...] = h.astype(o_ref.dtype)


def _streamed_kernel(x_ref, w_ref, b_ref, o_ref, h_ref, *, neg_slope, eps):
    # Grid = (batch_tiles, depth): one layer per inner grid step, weights double-buffered,
    # activations live in a persistent f32 VMEM scratch across the depth axis.
    # x_ref: (TB, E)   w_ref: (1, E, E)   b_ref: (1, 1, E)   o_ref: (TB, E)   h_ref: (TB, E) f32
    l = pl.program_id(1)

    @pl.when(l == 0)
    def _():
        x = x_ref[...].astype(jnp.float32)
        ss = jnp.sum(x * x, axis=-1, keepdims=True)
        h_ref[...] = x * jax.lax.rsqrt(jnp.maximum(ss, eps * eps))

    acc = jnp.dot(h_ref[...].astype(w_ref.dtype), w_ref[0],
                  preferred_element_type=jnp.float32)
    acc = acc + b_ref[0]
    h_ref[...] = jnp.maximum(acc, neg_slope * acc)

    @pl.when(l == pl.num_programs(1) - 1)
    def _():
        o_ref[...] = h_ref[...].astype(o_ref.dtype)


# ----------------------------------------------------------------------------- wrapper

def _vmem_budget_bytes():
    """Physical VMEM per core minus headroom; safe fallback if query unavailable."""
    cap = 64 * 1024 * 1024  # conservative (v7x) fallback
    try:
        cap = int(pltpu.get_tpu_info().vmem_capacity_bytes)
    except Exception:
        pass
    return cap - 16 * 1024 * 1024  # headroom for compiler scratch / pipeline internals


def _pick_block_batch(B, E, resident_param_bytes, budget):
    """Largest 8-aligned divisor of B that fits the budget, preferring >=2 grid steps
    (so the parallel axis can shard across v7x's two TensorCores)."""
    candidates = (1024, 512, 256, 128, 64, 32, 16, 8)
    best = None
    for cand in candidates:
        if B % cand != 0:
            continue
        io = 2 * (2 * cand * E * 4)  # double-buffered f32 input + output tiles
        if resident_param_bytes + io > budget:
            continue
        if best is None:
            best = cand              # largest fitting divisor (may give grid == 1)
        if B // cand >= 2:
            return cand              # largest fitting divisor with >= 2 grid steps
    return best if best is not None else B  # fall back to a single full-extent block


def style_vectorizer_forward(
    x, weights, biases, lr_mul=0.1, *,
    negative_slope=0.2, eps=1e-12,
    block_batch=None, compute_dtype=None, weight_streaming=None,
):
    """Fused StyleVectorizer forward (use_feats=False).

    x:       (B, E)          input latents
    weights: (depth, E, E)   PyTorch layout (out_dim, in_dim) per layer
    biases:  (depth, E)
    """
    B, E = x.shape
    depth = weights.shape[0]
    assert weights.shape == (depth, E, E), "weights must be (depth, emb, emb)"
    assert biases.shape == (depth, E), "biases must be (depth, emb)"

    if compute_dtype is None:
        # bf16 matmul inputs (f32 accumulate) — MXU-native on v5e/v6e/v7x.
        # Pass compute_dtype=jnp.float32 for an exact reference check.
        compute_dtype = jnp.bfloat16
    itemsize = jnp.dtype(compute_dtype).itemsize

    # One-time HBM-side parameter prep (amortized over all batch tiles):
    #   (out,in) -> (in,out) so the kernel contracts x @ W with a lane-dense RHS,
    #   lr_mul folded into both W and b (mathematically identical to scaling after).
    w_t = (jnp.transpose(weights, (0, 2, 1)).astype(jnp.float32) * lr_mul).astype(compute_dtype)
    b_scaled = (biases.astype(jnp.float32) * lr_mul).reshape(depth, 1, E)

    budget = _vmem_budget_bytes()
    w_bytes = depth * E * E * itemsize       # single-buffered resident weight stack
    b_bytes = depth * E * 4

    # Resident path needs the full weight stack + at least one minimal I/O tile in VMEM.
    resident_fits = (w_bytes + b_bytes + 2 * (2 * 8 * E * 4)) <= budget
    if weight_streaming is None:
        weight_streaming = not resident_fits

    if weight_streaming:
        # Per-step params: one (E,E) layer weight + bias, double-buffered; plus f32 scratch.
        param_bytes = 2 * (E * E * itemsize + E * 4)
    else:
        param_bytes = w_bytes + b_bytes

    if block_batch is None:
        # Streamed path also keeps a (TB,E) f32 activation scratch -> charge it to params.
        extra = 0 if not weight_streaming else 0  # scratch scales with TB; folded below
        block_batch = _pick_block_batch(B, E, param_bytes + extra, budget)
    assert B % block_batch == 0, "batch must be divisible by block_batch"
    assert block_batch == B or block_batch % 8 == 0, "block_batch must be 8-aligned (sublane)"
    # Note: E is a full-extent block dim so any E lowers; E % 128 == 0 keeps stores
    # lane-dense (avoids masked partial stores — the biggest single lever on v5e).

    io_bytes = 2 * (2 * block_batch * E * 4)             # double-buffered f32 in/out tiles
    scratch_bytes = block_batch * E * 4 if weight_streaming else 0
    need = param_bytes + io_bytes + scratch_bytes + (4 << 20)
    vmem_limit = int(min(max(need, 16 << 20), budget))

    cost = pl.CostEstimate(
        flops=int(2 * B * E * E * depth),
        transcendentals=0,
        bytes_accessed=int(x.size * x.dtype.itemsize
                           + w_t.size * itemsize
                           + b_scaled.size * 4
                           + B * E * x.dtype.itemsize),
    )

    if not weight_streaming:
        kernel = functools.partial(
            _resident_kernel, neg_slope=float(negative_slope), eps=float(eps))
        return pl.pallas_call(
            kernel,
            out_shape=jax.ShapeDtypeStruct((B, E), x.dtype),
            grid_spec=pltpu.PrefetchScalarGridSpec(
                num_scalar_prefetch=0,
                grid=(B // block_batch,),
                in_specs=[
                    # Batch-tiled activations: pipelined (double-buffered) across the grid.
                    pl.BlockSpec((block_batch, E), lambda i: (i, 0)),
                    # Constant-across-grid params: single-buffered to save VMEM.
                    pl.BlockSpec((depth, E, E), lambda i: (0, 0, 0),
                                 pipeline_mode=pl.Buffered(1)),
                    pl.BlockSpec((depth, 1, E), lambda i: (0, 0, 0),
                                 pipeline_mode=pl.Buffered(1)),
                ],
                out_specs=pl.BlockSpec((block_batch, E), lambda i: (i, 0)),
            ),
            compiler_params=pltpu.CompilerParams(
                dimension_semantics=("parallel",),
                vmem_limit_bytes=vmem_limit,
            ),
            cost_estimate=cost,
        )(x, w_t, b_scaled)

    # Weight-streaming fallback: depth as trailing "arbitrary" axis, layer weights
    # double-buffered, activations persist in a VMEM scratch across the layer loop.
    kernel = functools.partial(
        _streamed_kernel, neg_slope=float(negative_slope), eps=float(eps))
    return pl.pallas_call(
        kernel,
        out_shape=jax.ShapeDtypeStruct((B, E), x.dtype),
        grid_spec=pltpu.PrefetchScalarGridSpec(
            num_scalar_prefetch=0,
            grid=(B // block_batch, depth),
            in_specs=[
                pl.BlockSpec((block_batch, E), lambda i, l: (i, 0)),
                pl.BlockSpec((1, E, E), lambda i, l: (l, 0, 0)),
                pl.BlockSpec((1, 1, E), lambda i, l: (l, 0, 0)),
            ],
            out_specs=pl.BlockSpec((block_batch, E), lambda i, l: (i, 0)),
            scratch_shapes=[pltpu.VMEM((block_batch, E), jnp.float32)],
        ),
        compiler_params=pltpu.CompilerParams(
            dimension_semantics=("parallel", "arbitrary"),
            vmem_limit_bytes=vmem_limit,
        ),
        cost_estimate=cost,
    )(x, w_t, b_scaled)


# ----------------------------------------------------------------------------- test

if __name__ == "__main__":
    # Small deterministic config consistent with the module: emb=128 (lane-dense), depth=4.
    emb, depth, batch = 128, 4, 8
    lr_mul = 0.1

    key = jax.random.PRNGKey(0)
    kx, kw, kb = jax.random.split(key, 3)

    x = jax.random.normal(kx, (batch, emb), dtype=jnp.float32)
    # Module init: weight ~ randn(out, in), bias = zeros. Use small random biases here so
    # the fused bias path is actually exercised by the correctness check.
    weights = jax.random.normal(kw, (depth, emb, emb), dtype=jnp.float32)
    biases = 0.1 * jax.random.normal(kb, (depth, emb), dtype=jnp.float32)

    # Pure-JAX reference (f32, highest matmul precision).
    ref = x / jnp.maximum(jnp.sqrt(jnp.sum(x * x, axis=1, keepdims=True)), 1e-12)
    for l in range(depth):
        ref = jnp.dot(ref, (weights[l] * lr_mul).T,
                      precision=jax.lax.Precision.HIGHEST) + biases[l] * lr_mul
        ref = jnp.where(ref >= 0, ref, 0.2 * ref)

    # 1) f32 opt-in, resident-weight path: tight check.
    out_f32 = jax.block_until_ready(
        style_vectorizer_forward(x, weights, biases, lr_mul=lr_mul,
                                 compute_dtype=jnp.float32))
    assert out_f32.shape == (batch, emb)
    assert jnp.allclose(out_f32, ref, atol=1e-3, rtol=1e-3), "f32 resident mismatch"

    # 2) default bf16 path (MXU-native): looser tolerance for bf16 matmul inputs.
    out_bf16 = jax.block_until_ready(
        style_vectorizer_forward(x, weights, biases, lr_mul=lr_mul))
    assert jnp.allclose(out_bf16, ref, atol=5e-2, rtol=5e-2), "bf16 resident mismatch"

    # 3) weight-streaming fallback path (forced), f32 for a tight check.
    out_stream = jax.block_until_ready(
        style_vectorizer_forward(x, weights, biases, lr_mul=lr_mul,
                                 compute_dtype=jnp.float32, weight_streaming=True))
    assert jnp.allclose(out_stream, ref, atol=1e-3, rtol=1e-3), "streamed mismatch"

    print("KERNEL_OK")
</pallas_src>

<mosaic_0001>
module attributes {stable_mosaic.version = 11 : i64} {
  func.func @_resident_kernel(%arg0: i32, %arg1: memref<8x128xf32, #tpu.memory_space<vmem>>, %arg2: memref<4x128x128xf32, #tpu.memory_space<vmem>>, %arg3: memref<4x1x128xf32, #tpu.memory_space<vmem>>, %arg4: memref<8x128xf32, #tpu.memory_space<vmem>>) attributes {dimension_semantics = [#tpu.dimension_semantics<parallel>], iteration_bounds = array<i64: 1>, scalar_prefetch = 0 : i64, scratch_operands = 0 : i64, tpu.core_type = #tpu.core_type<tc>, window_params = [{transform_indices = @transform_0, window_bounds = array<i64: 8, 128>}, {pipeline_mode = #tpu.pipeline_mode<synchronous>, transform_indices = @transform_1, window_bounds = array<i64: 4, 128, 128>}, {pipeline_mode = #tpu.pipeline_mode<synchronous>, transform_indices = @transform_2, window_bounds = array<i64: 4, 1, 128>}, {transform_indices = @transform_3, window_bounds = array<i64: 8, 128>}]} {
    %c0 = arith.constant 0 : index
    %c0_0 = arith.constant 0 : index
    %0 = vector.load %arg1[%c0, %c0_0] : memref<8x128xf32, #tpu.memory_space<vmem>>, vector<8x128xf32>
    %1 = arith.mulf %0, %0 : vector<8x128xf32>
    %cst = arith.constant dense<0.000000e+00> : vector<8xf32>
    %2 = vector.multi_reduction <add>, %1, %cst [1] : vector<8x128xf32> to vector<8xf32>
    %3 = vector.shape_cast %2 : vector<8xf32> to vector<8x1xf32>
    %cst_1 = arith.constant 1.000000e-24 : f32
    %4 = vector.broadcast %cst_1 : f32 to vector<8x1xf32>
    %5 = arith.maximumf %3, %4 : vector<8x1xf32>
    %6 = math.rsqrt %5 : vector<8x1xf32>
    %7 = vector.broadcast %6 : vector<8x1xf32> to vector<8x128xf32>
    %8 = arith.mulf %0, %7 : vector<8x128xf32>
    %c0_2 = arith.constant 0 : index
    %c0_3 = arith.constant 0 : index
    %c0_4 = arith.constant 0 : index
    %9 = vector.load %arg2[%c0_2, %c0_3, %c0_4] : memref<4x128x128xf32, #tpu.memory_space<vmem>>, vector<1x128x128xf32>
    %10 = vector.shape_cast %9 : vector<1x128x128xf32> to vector<128x128xf32>
    %cst_5 = arith.constant dense<0.000000e+00> : vector<8x128xf32>
    %11 = tpu.matmul %8, %10, %cst_5 {dimension_numbers = #tpu.dot_dimension_numbers<[1], [0], [0], [1], [0, 0, 1, 1], [], []>} : vector<8x128xf32>, vector<128x128xf32>, vector<8x128xf32> -> vector<8x128xf32>
    %c0_6 = arith.constant 0 : index
    %c0_7 = arith.constant 0 : index
    %c0_8 = arith.constant 0 : index
    %12 = vector.load %arg3[%c0_6, %c0_7, %c0_8] : memref<4x1x128xf32, #tpu.memory_space<vmem>>, vector<1x1x128xf32>
    %13 = vector.shape_cast %12 : vector<1x1x128xf32> to vector<1x128xf32>
    %14 = vector.broadcast %13 : vector<1x128xf32> to vector<8x128xf32>
    %15 = arith.addf %11, %14 : vector<8x128xf32>
    %cst_9 = arith.constant 2.000000e-01 : f32
    %16 = vector.broadcast %cst_9 : f32 to vector<8x128xf32>
    %17 = arith.mulf %16, %15 : vector<8x128xf32>
    %18 = arith.maximumf %15, %17 : vector<8x128xf32>
    %c1 = arith.constant 1 : index
    %c0_10 = arith.constant 0 : index
    %c0_11 = arith.constant 0 : index
    %19 = vector.load %arg2[%c1, %c0_10, %c0_11] : memref<4x128x128xf32, #tpu.memory_space<vmem>>, vector<1x128x128xf32>
    %20 = vector.shape_cast %19 : vector<1x128x128xf32> to vector<128x128xf32>
    %cst_12 = arith.constant dense<0.000000e+00> : vector<8x128xf32>
    %21 = tpu.matmul %18, %20, %cst_12 {dimension_numbers = #tpu.dot_dimension_numbers<[1], [0], [0], [1], [0, 0, 1, 1], [], []>} : vector<8x128xf32>, vector<128x128xf32>, vector<8x128xf32> -> vector<8x128xf32>
    %c1_13 = arith.constant 1 : index
    %c0_14 = arith.constant 0 : index
    %c0_15 = arith.constant 0 : index
    %22 = vector.load %arg3[%c1_13, %c0_14, %c0_15] : memref<4x1x128xf32, #tpu.memory_space<vmem>>, vector<1x1x128xf32>
    %23 = vector.shape_cast %22 : vector<1x1x128xf32> to vector<1x128xf32>
    %24 = vector.broadcast %23 : vector<1x128xf32> to vector<8x128xf32>
    %25 = arith.addf %21, %24 : vector<8x128xf32>
    %cst_16 = arith.constant 2.000000e-01 : f32
    %26 = vector.broadcast %cst_16 : f32 to vector<8x128xf32>
    %27 = arith.mulf %26, %25 : vector<8x128xf32>
    %28 = arith.maximumf %25, %27 : vector<8x128xf32>
    %c2 = arith.constant 2 : index
    %c0_17 = arith.constant 0 : index
    %c0_18 = arith.constant 0 : index
    %29 = vector.load %arg2[%c2, %c0_17, %c0_18] : memref<4x128x128xf32, #tpu.memory_space<vmem>>, vector<1x128x128xf32>
    %30 = vector.shape_cast %29 : vector<1x128x128xf32> to vector<128x128xf32>
    %cst_19 = arith.constant dense<0.000000e+00> : vector<8x128xf32>
    %31 = tpu.matmul %28, %30, %cst_19 {dimension_numbers = #tpu.dot_dimension_numbers<[1], [0], [0], [1], [0, 0, 1, 1], [], []>} : vector<8x128xf32>, vector<128x128xf32>, vector<8x128xf32> -> vector<8x128xf32>
    %c2_20 = arith.constant 2 : index
    %c0_21 = arith.constant 0 : index
    %c0_22 = arith.constant 0 : index
    %32 = vector.load %arg3[%c2_20, %c0_21, %c0_22] : memref<4x1x128xf32, #tpu.memory_space<vmem>>, vector<1x1x128xf32>
    %33 = vector.shape_cast %32 : vector<1x1x128xf32> to vector<1x128xf32>
    %34 = vector.broadcast %33 : vector<1x128xf32> to vector<8x128xf32>
    %35 = arith.addf %31, %34 : vector<8x128xf32>
    %cst_23 = arith.constant 2.000000e-01 : f32
    %36 = vector.broadcast %cst_23 : f32 to vector<8x128xf32>
    %37 = arith.mulf %36, %35 : vector<8x128xf32>
    %38 = arith.maximumf %35, %37 : vector<8x128xf32>
    %c3 = arith.constant 3 : index
    %c0_24 = arith.constant 0 : index
    %c0_25 = arith.constant 0 : index
    %39 = vector.load %arg2[%c3, %c0_24, %c0_25] : memref<4x128x128xf32, #tpu.memory_space<vmem>>, vector<1x128x128xf32>
    %40 = vector.shape_cast %39 : vector<1x128x128xf32> to vector<128x128xf32>
    %cst_26 = arith.constant dense<0.000000e+00> : vector<8x128xf32>
    %41 = tpu.matmul %38, %40, %cst_26 {dimension_numbers = #tpu.dot_dimension_numbers<[1], [0], [0], [1], [0, 0, 1, 1], [], []>} : vector<8x128xf32>, vector<128x128xf32>, vector<8x128xf32> -> vector<8x128xf32>
    %c3_27 = arith.constant 3 : index
    %c0_28 = arith.constant 0 : index
    %c0_29 = arith.constant 0 : index
    %42 = vector.load %arg3[%c3_27, %c0_28, %c0_29] : memref<4x1x128xf32, #tpu.memory_space<vmem>>, vector<1x1x128xf32>
    %43 = vector.shape_cast %42 : vector<1x1x128xf32> to vector<1x128xf32>
    %44 = vector.broadcast %43 : vector<1x128xf32> to vector<8x128xf32>
    %45 = arith.addf %41, %44 : vector<8x128xf32>
    %cst_30 = arith.constant 2.000000e-01 : f32
    %46 = vector.broadcast %cst_30 : f32 to vector<8x128xf32>
    %47 = arith.mulf %46, %45 : vector<8x128xf32>
    %48 = arith.maximumf %45, %47 : vector<8x128xf32>
    %c0_31 = arith.constant 0 : index
    %c0_32 = arith.constant 0 : index
    %49 = vector.load %arg4[%c0_31, %c0_32] : memref<8x128xf32, #tpu.memory_space<vmem>>, vector<8x128xf32>
    tpu.vector_store %arg4[%c0_31, %c0_32], %48 {strides = array<i32>} : memref<8x128xf32, #tpu.memory_space<vmem>>, vector<8x128xf32>,
    return
  }
  func.func @transform_0(%arg0: i32) -> (i32, i32) {
    %c0_i32 = arith.constant 0 : i32
    %c0_i32_0 = arith.constant 0 : i32
    return %arg0, %c0_i32 : i32, i32
  }
  func.func @transform_1(%arg0: i32) -> (i32, i32, i32) {
    %c0_i32 = arith.constant 0 : i32
    %c0_i32_0 = arith.constant 0 : i32
    %c0_i32_1 = arith.constant 0 : i32
    %c0_i32_2 = arith.constant 0 : i32
    return %c0_i32, %c0_i32_0, %c0_i32_1 : i32, i32, i32
  }
  func.func @transform_2(%arg0: i32) -> (i32, i32, i32) {
    %c0_i32 = arith.constant 0 : i32
    %c0_i32_0 = arith.constant 0 : i32
    %c0_i32_1 = arith.constant 0 : i32
    %c0_i32_2 = arith.constant 0 : i32
    return %c0_i32, %c0_i32_0, %c0_i32_1 : i32, i32, i32
  }
  func.func @transform_3(%arg0: i32) -> (i32, i32) {
    %c0_i32 = arith.constant 0 : i32
    %c0_i32_0 = arith.constant 0 : i32
    return %arg0, %c0_i32 : i32, i32
  }
}

</mosaic_0001>

<bundles_post_ra>
// kernel: tpu_custom_call.1
= control target key start
LH: loop header
LB: loop body
LE: loop exit
PB: predicated region body
PF: predicated region fallthrough
CT: control target
= control target key end

     0   :  { %8 = vsyncpa [#allocation3], 0  ;;  %s972_s0 = inlined_call_operand.hbm [shape: f32[8,128], index: 0, kind: input, shape index: {}]   ;;  %s973_s1 = inlined_call_operand.hbm [shape: f32[4,128,128], index: 1, kind: input, shape index: {}]   ;;  %s974_s2 = inlined_call_operand.vmem [shape: f32[4,1,128], index: 2, kind: input, shape index: {}]   ;;  %s975_s3 = inlined_call_operand.hbm [shape: f32[8,128], index: 3, kind: output, shape index: {}]  }
   0x1   :  { %9 = vsyncpa [#allocation6], 0 }
   0x2   :  { %10 = vsyncpa [#allocation4], 0  ;;  %s844_s12 = smov [#allocation2]   ;;  %s845_s14 = smov [#allocation5]  }
   0x3   :  { %s17_s13 = sshll.u32 %s844_s12, 4  ;;  %s26_s15 = sshll.u32 %s845_s14, 4  ;;  %s18_s13 = int_to_ptr.vmem [resolvable:$true] %s17_s13  ;;  %s872_s15 = int_to_ptr.vmem [resolvable:$true] %s26_s15 }
   0x4   :  { %s772_s18 = scalar_lea.hbm %s972_s0, 128 }
   0x5   :  { %p773_p0 = scmp.ne.s32.totalorder %s972_s0, %s772_s18  ;;  %p776_p1 = scmp.lt.u32.totalorder %s772_s18, %s972_s0 }
   0x7   :  { %p778_p2 = pnand %p776_p1, %p773_p0 }
   0x9   :  { %781 = shalt.err (!%p778_p2)
}
   0xa   :  { %s782_s23 = scalar_lea.vmem %s18_s13, 128  ;;  %p787_p4 = scmp.lt.s32.totalorder %s18_s13, %s18_s13 }
   0xb   :  { %p783_p3 = scmp.ne.s32.totalorder %s18_s13, %s782_s23  ;;  %p788_p5 = scmp.lt.s32.totalorder %s782_s23, %s782_s23 }
   0xd   :  { %p789_p6 = por %p788_p5, %p787_p4 }
   0xf   :  { %p790_p7 = pnand %p789_p6, %p783_p3 }
  0x11   :  { %793 = shalt.err (!%p790_p7)
}
  0x12   :  { %20 = dma.hbm_to_vmem [thread:$0]  %s972_s0, 128, %s18_s13, [#allocation3]  }
  0x13   :  { %s794_s28 = scalar_lea.hbm %s973_s1, 8192 }
  0x14   :  { %p795_p8 = scmp.ne.s32.totalorder %s973_s1, %s794_s28  ;;  %p798_p9 = scmp.lt.u32.totalorder %s794_s28, %s973_s1 }
  0x16   :  { %p800_p10 = pnand %p798_p9, %p795_p8 }
  0x18   :  { %803 = shalt.err (!%p800_p10)
}
  0x19   :  { %s804_s6 = scalar_lea.vmem %s872_s15, 8192  ;;  %p809_p12 = scmp.lt.s32.totalorder %s872_s15, %s872_s15 }
  0x1a   :  { %p805_p11 = scmp.ne.s32.totalorder %s872_s15, %s804_s6  ;;  %p810_p13 = scmp.lt.s32.totalorder %s804_s6, %s804_s6 }
  0x1c   :  { %p811_p0 = por %p810_p13, %p809_p12 }
  0x1e   :  { %p812_p1 = pnand %p811_p0, %p805_p11 }
  0x20   :  { %815 = shalt.err (!%p812_p1)
}
  0x21   :  { %s846_s0 = smov 128   ;;  %s847_s7 = smov 8  }
  0x22   :  { %32 = dma.hbm_to_vmem [thread:$0]  %s973_s1, 8192, %s872_s15, [#allocation6], %s846_s0, %s846_s0, %s847_s7  }
  0x23   :  { %838 = dma.done.wait [#allocation3], 128  }
  0x24   :  { %839 = vsyncadd [#allocation3], 4294967168 }
  0x25   :  { %840 = dma.done.wait [#allocation6], 8192  }
  0x26   :  { %841 = vsyncadd [#allocation6], 4294959104  ;;  %v848_v0 = vmov 0.0|0.0   ;;  %v905_v1 = vld [vmem:[#allocation2] sm:$0xff]  ;;  %v48_v2 = vld [vmem:[#allocation5] sm:$0xff]  ;;  %vm849_vm0 = vmmov 0  }
  0x27   :  { %666 = vmatprep.subr.bf16.mxu0 %v848_v0  ;;  %690 = vmatprep.subr.bf16.mxu1 %v848_v0  ;;  %v49_v3 = vld [vmem:[#allocation5 + $0x8] sm:$0xff]  ;;  %v42_v4 = vmul.f32 %v905_v1, %v905_v1  ;;  %v50_v6 = vld [vmem:[#allocation5 + $0x10] sm:$0xff]  ;;  %v51_v7 = vld [vmem:[#allocation5 + $0x18] sm:$0xff]  ;;  %v850_v23 = vmov 0.0   ;;  %s851_s17 = smov [#allocation7]  }
  0x28   :  { %v667_v5 = vpack.c.bf16 %v49_v3, %v48_v2  ;;  %v670_v8 = vpack.c.bf16 %v51_v7, %v50_v6  ;;  %v52_v9 = vld [vmem:[#allocation5 + $0x20] sm:$0xff]  ;;  %v53_v10 = vld [vmem:[#allocation5 + $0x28] sm:$0xff]  ;;  %v54_v12 = vld [vmem:[#allocation5 + $0x30] sm:$0xff]  ;;  %558 = vmatprep.mubr.msk.f32.mxu0 %vm849_vm0, %v850_v23  ;;  %593 = vmatprep.mubr.msk.f32.mxu1 %vm849_vm0, %v850_v23  ;;  %s441_s18 = sshll.u32 %s851_s17, 4  ;;  %s442_s18 = int_to_ptr.vmem [resolvable:$true] %s441_s18 }
  0x29   :  { %43 = vadd.xlane.f32.xlu0 %v42_v4  ;;  %v673_v11 = vpack.c.bf16 %v53_v10, %v52_v9  ;;  %v55_v13 = vld [vmem:[#allocation5 + $0x38] sm:$0xff]  ;;  %v56_v15 = vld [vmem:[#allocation5 + $0x40] sm:$0xff]  ;;  %v57_v16 = vld [vmem:[#allocation5 + $0x48] sm:$0xff]  ;;  %s816_s19 = scalar_lea.vmem %s442_s18, 128  ;;  %p821_p3 = scmp.lt.s32.totalorder %s442_s18, %s442_s18 }
  0x2a   :  { %668 = vmatpush3.bf16.msra.mxu0 %v667_v5  ;;  %v676_v14 = vpack.c.bf16 %v55_v13, %v54_v12  ;;  %v679_v17 = vpack.c.bf16 %v57_v16, %v56_v15  ;;  %v58_v18 = vld [vmem:[#allocation5 + $0x50] sm:$0xff]  ;;  %v59_v19 = vld [vmem:[#allocation5 + $0x58] sm:$0xff]  ;;  %v60_v21 = vld [vmem:[#allocation5 + $0x60] sm:$0xff]  ;;  %p817_p2 = scmp.ne.s32.totalorder %s442_s18, %s816_s19  ;;  %p822_p4 = scmp.lt.s32.totalorder %s816_s19, %s816_s19 }
  0x2b   :  { %669 = vmatprep.subr.bf16.mxu0 %v848_v0  ;;  %v682_v20 = vpack.c.bf16 %v59_v19, %v58_v18  ;;  %v61_v22 = vld [vmem:[#allocation5 + $0x68] sm:$0xff]  ;;  %v62_v25 = vld [vmem:[#allocation5 + $0x70] sm:$0xff]  ;;  %v63_v26 = vld [vmem:[#allocation5 + $0x78] sm:$0xff] }
  0x2c   :  { %v685_v24 = vpack.c.bf16 %v61_v22, %v60_v21  ;;  %v688_v27 = vpack.c.bf16 %v63_v26, %v62_v25  ;;  %v144_v28 = vld [vmem:[#allocation5 + $0x80] sm:$0xff]  ;;  %v145_v29 = vld [vmem:[#allocation5 + $0x88] sm:$0xff]  ;;  %v146_v30 = vld [vmem:[#allocation5 + $0x90] sm:$0xff]  ;;  %p823_p5 = por %p822_p4, %p821_p3 }
  0x2d   :  { %v691_v31 = vpack.c.bf16 %v145_v29, %v144_v28  ;;  %v147_v32 = vld [vmem:[#allocation5 + $0x98] sm:$0xff]  ;;  %v148_v34 = vld [vmem:[#allocation5 + $0xa0] sm:$0xff]  ;;  %v149_v35 = vld [vmem:[#allocation5 + $0xa8] sm:$0xff] }
  0x2e   :  { %671 = vmatpush3.bf16.msra.mxu0 %v670_v8  ;;  %v694_v33 = vpack.c.bf16 %v147_v32, %v146_v30  ;;  %v697_v36 = vpack.c.bf16 %v149_v35, %v148_v34  ;;  %v150_v37 = vld [vmem:[#allocation5 + $0xb0] sm:$0xff]  ;;  %v151_v38 = vld [vmem:[#allocation5 + $0xb8] sm:$0xff]  ;;  %v152_v40 = vld [vmem:[#allocation5 + $0xc0] sm:$0xff]  ;;  %p824_p6 = pnand %p823_p5, %p817_p2 }
  0x2f   :  { %672 = vmatprep.subr.bf16.mxu0 %v848_v0  ;;  %692 = vmatpush3.bf16.msra.mxu1 %v691_v31  ;;  %v700_v39 = vpack.c.bf16 %v151_v38, %v150_v37  ;;  %v153_v41 = vld [vmem:[#allocation5 + $0xc8] sm:$0xff]  ;;  %v154_v43 = vld [vmem:[#allocation5 + $0xd0] sm:$0xff]  ;;  %v155_v44 = vld [vmem:[#allocation5 + $0xd8] sm:$0xff] }
  0x30   :  { %693 = vmatprep.subr.bf16.mxu1 %v848_v0  ;;  %v703_v42 = vpack.c.bf16 %v153_v41, %v152_v40  ;;  %v706_v45 = vpack.c.bf16 %v155_v44, %v154_v43  ;;  %v156_v50 = vld [vmem:[#allocation5 + $0xe0] sm:$0xff]  ;;  %v157_v51 = vld [vmem:[#allocation5 + $0xe8] sm:$0xff]  ;;  %v158_v53 = vld [vmem:[#allocation5 + $0xf0] sm:$0xff] }
  0x31   :  { %v709_v52 = vpack.c.bf16 %v157_v51, %v156_v50  ;;  %v159_v54 = vld [vmem:[#allocation5 + $0xf8] sm:$0xff]  ;;  %v241_v56 = vld [vmem:[#allocation5 + $0x100] sm:$0xff]  ;;  %v242_v57 = vld [vmem:[#allocation5 + $0x108] sm:$0xff] }
  0x32   :  { %674 = vmatpush3.bf16.msra.mxu0 %v673_v11  ;;  %v712_v55 = vpack.c.bf16 %v159_v54, %v158_v53  ;;  %v243_v58 = vld [vmem:[#allocation5 + $0x110] sm:$0xff]  ;;  %v715_v59 = vpack.c.bf16 %v242_v57, %v241_v56  ;;  %v244_v60 = vld [vmem:[#allocation5 + $0x118] sm:$0xff]  ;;  %v245_v62 = vld [vmem:[#allocation5 + $0x120] sm:$0xff] }
  0x33   :  { %675 = vmatprep.subr.bf16.mxu0 %v848_v0  ;;  %695 = vmatpush3.bf16.msra.mxu1 %v694_v33  ;;  %v718_v61 = vpack.c.bf16 %v244_v60, %v243_v58  ;;  %v246_v63 = vld [vmem:[#allocation5 + $0x128] sm:$0xff]  ;;  %v247_v2 = vld [vmem:[#allocation5 + $0x130] sm:$0xff]  ;;  %v248_v3 = vld [vmem:[#allocation5 + $0x138] sm:$0xff] }
  0x34   :  { %696 = vmatprep.subr.bf16.mxu1 %v848_v0  ;;  %v724_v4 = vpack.c.bf16 %v248_v3, %v247_v2  ;;  %v249_v5 = vld [vmem:[#allocation5 + $0x140] sm:$0xff]  ;;  %v250_v6 = vld [vmem:[#allocation5 + $0x148] sm:$0xff]  ;;  %v251_v8 = vld [vmem:[#allocation5 + $0x150] sm:$0xff] }
  0x35   :  { %v727_v7 = vpack.c.bf16 %v250_v6, %v249_v5  ;;  %v252_v9 = vld [vmem:[#allocation5 + $0x158] sm:$0xff]  ;;  %v254_v18 = vld [vmem:[#allocation5 + $0x168] sm:$0xff]  ;;  %v340_v26 = vld [vmem:[#allocation5 + $0x190] sm:$0xff] }
  0x36   :  { %677 = vmatpush3.bf16.msra.mxu0 %v676_v14  ;;  %v730_v10 = vpack.c.bf16 %v252_v9, %v251_v8  ;;  %v451_v11 = vld [vmem:[%s974_s2] ss:$0 sm:$0xff]  ;;  %v339_v25 = vld [vmem:[#allocation5 + $0x188] sm:$0xff]  ;;  %v344_v32 = vld [vmem:[#allocation5 + $0x1b0] sm:$0xff] }
  0x37   :  { %678 = vmatprep.subr.bf16.mxu0 %v848_v0  ;;  %698 = vmatpush3.bf16.msra.mxu1 %v697_v36  ;;  %v256_v21 = vld [vmem:[#allocation5 + $0x178] sm:$0xff]  ;;  %v343_v30 = vld [vmem:[#allocation5 + $0x1a8] sm:$0xff]  ;;  %v346_v35 = vld [vmem:[#allocation5 + $0x1c0] sm:$0xff] }
  0x38   :  { %699 = vmatprep.subr.bf16.mxu1 %v848_v0  ;;  %v341_v28 = vld [vmem:[#allocation5 + $0x198] sm:$0xff]  ;;  %v347_v36 = vld [vmem:[#allocation5 + $0x1c8] sm:$0xff]  ;;  %v348_v38 = vld [vmem:[#allocation5 + $0x1d0] sm:$0xff] }
  0x39   :  { %v742_v29 = vpack.c.bf16 %v341_v28, %v340_v26  ;;  %v345_v33 = vld [vmem:[#allocation5 + $0x1b8] sm:$0xff]  ;;  %v751_v37 = vpack.c.bf16 %v347_v36, %v346_v35  ;;  %v352_v50 = vld [vmem:[#allocation5 + $0x1f0] sm:$0xff] }
  0x3a   :  { %680 = vmatpush3.bf16.msra.mxu0 %v679_v17  ;;  %v253_v17 = vld [vmem:[#allocation5 + $0x160] sm:$0xff]  ;;  %v748_v34 = vpack.c.bf16 %v345_v33, %v344_v32  ;;  %v453_v41 = vld [vmem:[%s974_s2 + $0x1] ss:$0 sm:$0xff]  ;;  %v455_v53 = vld [vmem:[%s974_s2 + $0x2] ss:$0 sm:$0xff] }
  0x3b   :  { %681 = vmatprep.subr.bf16.mxu0 %v848_v0  ;;  %701 = vmatpush3.bf16.msra.mxu1 %v700_v39  ;;  %v733_v19 = vpack.c.bf16 %v254_v18, %v253_v17  ;;  %v349_v39 = vld [vmem:[#allocation5 + $0x1d8] sm:$0xff] }
  0x3c   :  { %702 = vmatprep.subr.bf16.mxu1 %v848_v0  ;;  %v754_v40 = vpack.c.bf16 %v349_v39, %v348_v38  ;;  %v353_v51 = vld [vmem:[#allocation5 + $0x1f8] sm:$0xff] }
  0x3e   :  { %683 = vmatpush3.bf16.msra.mxu0 %v682_v20  ;;  %v255_v20 = vld [vmem:[#allocation5 + $0x170] sm:$0xff] }
  0x3f   :  { %684 = vmatprep.subr.bf16.mxu0 %v848_v0  ;;  %704 = vmatpush3.bf16.msra.mxu1 %v703_v42  ;;  %v736_v22 = vpack.c.bf16 %v256_v21, %v255_v20 }
  0x40   :  { %705 = vmatprep.subr.bf16.mxu1 %v848_v0 }
  0x42   :  { %686 = vmatpush3.bf16.msra.mxu0 %v685_v24  ;;  %v338_v24 = vld [vmem:[#allocation5 + $0x180] sm:$0xff] }
  0x43   :  { %687 = vmatprep.subr.bf16.mxu0 %v848_v0  ;;  %707 = vmatpush3.bf16.msra.mxu1 %v706_v45 }
  0x44   :  { %708 = vmatprep.subr.bf16.mxu1 %v848_v0 }
  0x46   :  { %689 = vmatpush3.bf16.msra.mxu0 %v688_v27  ;;  %v739_v27 = vpack.c.bf16 %v339_v25, %v338_v24 }
  0x47   :  { %714 = vmatprep.subr.bf16.mxu0 %v848_v0  ;;  %710 = vmatpush3.bf16.msra.mxu1 %v709_v52  ;;  %v760_v52 = vpack.c.bf16 %v353_v51, %v352_v50 }
  0x48   :  { %711 = vmatprep.subr.bf16.mxu1 %v848_v0 }
  0x4b   :  { %713 = vmatpush3.bf16.msra.mxu1 %v712_v55 }
  0x4c   :  { %738 = vmatprep.subr.bf16.mxu1 %v848_v0 }
  0xb6   :  { %v44_v46 = vpop.xlane.xlu0 %43 }
  0xb7   :  { %v45_v47 = vmax.f32 %v44_v46, 1e-24 }
  0xb9   :  { %770 = vrsqrt.f32 %v45_v47  ;;  %v350_v47 = vld [vmem:[#allocation5 + $0x1e0] sm:$0xff] }
  0xc3   :  { %v771_v48 = vpop.eup %770 }
  0xc4   :  { %v47_v49 = vmul.f32 %v771_v48, %v905_v1  ;;  %v721_v1 = vpack.c.bf16 %v246_v63, %v245_v62  ;;  %v351_v48 = vld [vmem:[#allocation5 + $0x1e8] sm:$0xff] }
  0xc6   :  { %559 = vmatmul.mubr.f32.vlgmr.msra.gmra.mrb[0].mxu0 %v47_v49  ;;  %v757_v49 = vpack.c.bf16 %v351_v48, %v350_v47 }
  0xc7   :  { %628 = vmatprep.mubr.msk.f32.mxu0 %vm849_vm0, %v850_v23  ;;  %716 = vmatpush3.bf16.msra.mxu0 %v715_v59  ;;  %v457_v59 = vld [vmem:[%s974_s2 + $0x3] ss:$0 sm:$0xff] }
  0xc8   :  { %717 = vmatprep.subr.bf16.mxu0 %v848_v0 }
  0xcb   :  { %719 = vmatpush3.bf16.msra.mxu0 %v718_v61 }
  0xcc   :  { %720 = vmatprep.subr.bf16.mxu0 %v848_v0 }
  0xcf   :  { %722 = vmatpush3.bf16.msra.mxu0 %v721_v1 }
  0xd0   :  { %723 = vmatprep.subr.bf16.mxu0 %v848_v0 }
  0xd3   :  { %725 = vmatpush3.bf16.msra.mxu0 %v724_v4 }
  0xd4   :  { %726 = vmatprep.subr.bf16.mxu0 %v848_v0 }
  0xd7   :  { %728 = vmatpush3.bf16.msra.mxu0 %v727_v7 }
  0xd8   :  { %729 = vmatprep.subr.bf16.mxu0 %v848_v0 }
  0xdb   :  { %731 = vmatpush3.bf16.msra.mxu0 %v730_v10 }
  0xdc   :  { %732 = vmatprep.subr.bf16.mxu0 %v848_v0 }
  0xdf   :  { %734 = vmatpush3.bf16.msra.mxu0 %v733_v19 }
  0xe0   :  { %735 = vmatprep.subr.bf16.mxu0 %v848_v0 }
  0xe3   :  { %737 = vmatpush3.bf16.msra.mxu0 %v736_v22 }
 0x199   :  { %v137_v12 = vpop.f32.mrb[0].mxu0 }
 0x19a   :  { %v138_v13 = vadd.f32 %v451_v11, %v137_v12  ;;  %v560_v14 = vpop.f32.mrb[1].mxu0 }
 0x19c   :  { %v141_v15 = vmul.f32 0.2, %v138_v13 }
 0x19e   :  { %v142_v16 = vmax.f32 %v138_v13, %v141_v15 }
 0x1a0   :  { %594 = vmatmul.mubr.f32.vlgmr.msra.gmra.mrb[0].mxu1 %v142_v16 }
 0x1a1   :  { %663 = vmatprep.mubr.msk.f32.mxu1 %vm849_vm0, %v850_v23  ;;  %740 = vmatpush3.bf16.msra.mxu1 %v739_v27  ;;  %v342_v23 = vld [vmem:[#allocation5 + $0x1a0] sm:$0xff] }
 0x1a2   :  { %741 = vmatprep.subr.bf16.mxu1 %v848_v0  ;;  %v745_v31 = vpack.c.bf16 %v343_v30, %v342_v23 }
 0x1a5   :  { %743 = vmatpush3.bf16.msra.mxu1 %v742_v29 }
 0x1a6   :  { %744 = vmatprep.subr.bf16.mxu1 %v848_v0 }
 0x1a9   :  { %746 = vmatpush3.bf16.msra.mxu1 %v745_v31 }
 0x1aa   :  { %747 = vmatprep.subr.bf16.mxu1 %v848_v0 }
 0x1ad   :  { %749 = vmatpush3.bf16.msra.mxu1 %v748_v34 }
 0x1ae   :  { %750 = vmatprep.subr.bf16.mxu1 %v848_v0 }
 0x1b1   :  { %752 = vmatpush3.bf16.msra.mxu1 %v751_v37 }
 0x1b2   :  { %753 = vmatprep.subr.bf16.mxu1 %v848_v0 }
 0x1b5   :  { %755 = vmatpush3.bf16.msra.mxu1 %v754_v40 }
 0x1b6   :  { %756 = vmatprep.subr.bf16.mxu1 %v848_v0 }
 0x1b9   :  { %758 = vmatpush3.bf16.msra.mxu1 %v757_v49 }
 0x1ba   :  { %759 = vmatprep.subr.bf16.mxu1 %v848_v0 }
 0x1bd   :  { %761 = vmatpush3.bf16.msra.mxu1 %v760_v52 }
 0x273   :  { %v234_v42 = vpop.f32.mrb[0].mxu1 }
 0x274   :  { %v235_v43 = vadd.f32 %v453_v41, %v234_v42  ;;  %v595_v44 = vpop.f32.mrb[1].mxu1 }
 0x276   :  { %v238_v45 = vmul.f32 0.2, %v235_v43 }
 0x278   :  { %v239_v46 = vmax.f32 %v235_v43, %v238_v45 }
 0x27a   :  { %629 = vmatmul.mubr.f32.vlgmr.msra.gmra.mrb[2].mxu0 %v239_v46 }
 0x34d   :  { %v331_v54 = vpop.f32.mrb[2].mxu0 }
 0x34e   :  { %v332_v55 = vadd.f32 %v455_v53, %v331_v54  ;;  %v630_v56 = vpop.f32.mrb[3].mxu0 }
 0x350   :  { %v335_v57 = vmul.f32 0.2, %v332_v55 }
 0x352   :  { %v336_v58 = vmax.f32 %v332_v55, %v335_v57 }
 0x354   :  { %664 = vmatmul.mubr.f32.vlgmr.msra.gmra.mrb[2].mxu1 %v336_v58 }
 0x427   :  { %v428_v60 = vpop.f32.mrb[2].mxu1 }
 0x428   :  { %v429_v0 = vadd.f32 %v457_v59, %v428_v60  ;;  %v665_v61 = vpop.f32.mrb[3].mxu1 }
 0x42a   :  { %v432_v62 = vmul.f32 0.2, %v429_v0 }
 0x42c   :  { %v433_v63 = vmax.f32 %v429_v0, %v432_v62 }
 0x42e   :  { %434 = vst [vmem:[#allocation7] sm:$0xff] %v433_v63 }
 0x42f   :  { %827 = shalt.err (!%p824_p6)
}
 0x430   :  { %s828_s2 = scalar_lea.hbm %s975_s3, 128 }
 0x431   :  { %p829_p7 = scmp.ne.s32.totalorder %s975_s3, %s828_s2  ;;  %p832_p8 = scmp.lt.u32.totalorder %s828_s2, %s975_s3 }
 0x433   :  { %p834_p9 = pnand %p832_p8, %p829_p7 }
 0x435   :  { %837 = shalt.err (!%p834_p9)
}
 0x436   :  { %444 = dma.vmem_to_hbm [thread:$0]  %s442_s18, 128, %s975_s3, [#allocation4]  }
 0x437   :  { %842 = dma.done.wait [#allocation4], 128  }
 0x438   :  { %843 = vsyncadd [#allocation4], 4294967168 }
 0x439   :  { %448 = vsyncpa [#allocation3], 1 }
 0x43a   :  { %449 = vsyncpa [#allocation6], 1 }
 0x43b   :  { %450 = vsyncpa [#allocation4], 1 }

</bundles_post_ra>
